<compile_context>
chip_gen: v7x
topology: tpu7x:2x2x1
jax: 0.10.0
libtpu: 0.0.40
codegen_flags: <defaults>
</compile_context>

<pallas_src>
import functools

import jax
import jax.numpy as jnp
from jax import lax
from jax.experimental import pallas as pl
from jax.experimental.pallas import tpu as pltpu


# --------------------------------------------------------------------------
# helpers
# --------------------------------------------------------------------------
def _pick_block(total, unit, target):
    """Largest multiple of `unit` dividing `total`, capped at `target`.

    Falls back to `total` (full-dimension block, always legal) when `total`
    is not a multiple of `unit`.
    """
    if total % unit != 0:
        return total
    cap = min(total, max(unit, target))
    best = unit
    t = unit
    while t <= cap:
        if total % t == 0:
            best = t
        t += unit
    return best


def _scoped_vmem_limit():
    """Per-generation scoped-VMEM budget (half of physical, capped at 64 MiB)."""
    cap = None
    try:
        info = pltpu.get_tpu_info()
        cap = getattr(info, "vmem_capacity_bytes", None)
    except Exception:
        cap = None
    if not cap:
        cap = 128 * 1024 * 1024  # conservative default (v5e/v6e physical)
    return int(min(cap // 2, 64 * 1024 * 1024))


# --------------------------------------------------------------------------
# kernels
# --------------------------------------------------------------------------
def _fused_small_kernel(*refs, num_parallel, inv_count, eps):
    """Single-pass fast path: everything resident in VMEM.

    refs = (x_0..x_{P-1}, gamma_0.., beta_0.., o_0..o_{P-1})
      x_i, o_i : (N, C, HW)   gamma_i, beta_i : (C, 1)
    """
    p = num_parallel
    x_refs = refs[:p]
    g_refs = refs[p:2 * p]
    b_refs = refs[2 * p:3 * p]
    o_refs = refs[3 * p:4 * p]

    for i in range(p):
        n_imgs = x_refs[i].shape[0]
        c = x_refs[i].shape[1]
        s = jnp.zeros((c, 1), jnp.float32)
        sq = jnp.zeros((c, 1), jnp.float32)
        slabs = []
        for n in range(n_imgs):
            xn = x_refs[i][n].astype(jnp.float32)          # (C, HW)
            slabs.append(xn)
            s = s + jnp.sum(xn, axis=-1, keepdims=True)
            sq = sq + jnp.sum(xn * xn, axis=-1, keepdims=True)
        mean = s * inv_count
        var = jnp.maximum(sq * inv_count - mean * mean, 0.0)   # biased, clamped
        inv = lax.rsqrt(var + eps)
        scale = g_refs[i][...] * inv                           # (C, 1)
        shift = b_refs[i][...] - mean * scale
        for n in range(n_imgs):
            o_refs[i][n] = (slabs[n] * scale + shift).astype(o_refs[i].dtype)


def _stats_kernel(*refs, num_parallel, lanep, inv_count, eps):
    """Pass 1: per-channel stats + fused scale/shift epilogue.

    refs = (x_0..x_{P-1}, gamma_0.., beta_0..,
            scale_0.., shift_0..,            # outputs, (c_t, 1) resident
            psum_0.., psq_0..)               # VMEM scratch, (c_t, lanep)
    Per-lane partial sums are accumulated with plain VPU adds; the cross-lane
    (XLU) reduce and the scale/shift math run once at the last (n, m) step.
    """
    p = num_parallel
    x_refs = refs[:p]
    g_refs = refs[p:2 * p]
    b_refs = refs[2 * p:3 * p]
    scale_refs = refs[3 * p:4 * p]
    shift_refs = refs[4 * p:5 * p]
    psum_refs = refs[5 * p:6 * p]
    psq_refs = refs[6 * p:7 * p]

    n_id = pl.program_id(1)
    m_id = pl.program_id(2)
    first = (n_id == 0) & (m_id == 0)
    last = (n_id == pl.num_programs(1) - 1) & (m_id == pl.num_programs(2) - 1)

    @pl.when(first)
    def _():
        for i in range(p):
            psum_refs[i][...] = jnp.zeros_like(psum_refs[i])
            psq_refs[i][...] = jnp.zeros_like(psq_refs[i])

    for i in range(p):
        x = x_refs[i][...].astype(jnp.float32)                 # (c_t, m_t)
        m_t = x.shape[-1]
        if lanep > 1:
            # per-lane partials: pure VPU adds (no XLU in the inner loop)
            ps = psum_refs[i][...]
            pq = psq_refs[i][...]
            for k in range(m_t // lanep):
                sl = x[:, k * lanep:(k + 1) * lanep]
                ps = ps + sl
                pq = pq + sl * sl
            psum_refs[i][...] = ps
            psq_refs[i][...] = pq
        else:
            # lane-sparse fallback (m_t not a multiple of 128)
            psum_refs[i][...] += jnp.sum(x, axis=-1, keepdims=True)
            psq_refs[i][...] += jnp.sum(x * x, axis=-1, keepdims=True)

    @pl.when(last)
    def _():
        for i in range(p):
            s = jnp.sum(psum_refs[i][...], axis=-1, keepdims=True)   # (c_t,1)
            sq = jnp.sum(psq_refs[i][...], axis=-1, keepdims=True)
            mean = s * inv_count
            var = jnp.maximum(sq * inv_count - mean * mean, 0.0)
            inv = lax.rsqrt(var + eps)
            scale = g_refs[i][...] * inv
            shift = b_refs[i][...] - mean * scale
            scale_refs[i][...] = scale
            shift_refs[i][...] = shift


def _norm_kernel(*refs, num_parallel):
    """Pass 2: y = x * scale + shift (one FMA per element, per branch)."""
    p = num_parallel
    x_refs = refs[:p]
    scale_refs = refs[p:2 * p]
    shift_refs = refs[2 * p:3 * p]
    o_refs = refs[3 * p:4 * p]

    for i in range(p):
        x = x_refs[i][...].astype(jnp.float32)                 # (c_t, m_t)
        y = x * scale_refs[i][...] + shift_refs[i][...]        # (c_t,1) bcast
        o_refs[i][...] = y.astype(o_refs[i].dtype)


# --------------------------------------------------------------------------
# wrapper
# --------------------------------------------------------------------------
def batchnorm2d_parallel_pallas(xs, gammas, betas, *, eps=1e-5,
                                force_two_pass=False):
    """Fused train-mode BatchNorm2d over a list of NCHW inputs (one BN each)."""
    num_parallel = len(xs)
    N, C, H, W = xs[0].shape
    for x in xs:
        assert x.shape == (N, C, H, W), "all branches must share the NCHW shape"
    HW = H * W
    inv_count = 1.0 / float(N * HW)

    vmem_limit = _scoped_vmem_limit()
    itemsize = jnp.dtype(xs[0].dtype).itemsize
    sub_unit = {1: 32, 2: 16}.get(itemsize, 8)     # dtype-aware sublane unit

    # Free reshape (H, W are trailing contiguous dims): no HBM traffic.
    xs_flat = [x.reshape(N, C, HW) for x in xs]
    gs = [g.astype(jnp.float32).reshape(C, 1) for g in gammas]
    bs = [b.astype(jnp.float32).reshape(C, 1) for b in betas]

    # ---- fully-resident single-pass fast path (small feature maps) ----
    total_f32_bytes = num_parallel * N * C * HW * 4
    if (not force_two_pass) and (3 * total_f32_bytes <= vmem_limit // 2) and N <= 32:
        outs = pl.pallas_call(
            functools.partial(_fused_small_kernel, num_parallel=num_parallel,
                              inv_count=inv_count, eps=eps),
            out_shape=[jax.ShapeDtypeStruct((N, C, HW), xs[i].dtype)
                       for i in range(num_parallel)],
            compiler_params=pltpu.CompilerParams(vmem_limit_bytes=vmem_limit),
        )(*xs_flat, *gs, *bs)
        return [o.reshape(N, C, H, W) for o in outs]

    # ---- streaming two-pass path ----
    # Channel block: up to 128 sublanes; if C gives only one block but can be
    # split, halve it so v7x megacore has >= 2 parallel blocks for pass 1.
    c_t = _pick_block(C, sub_unit, 128)
    if C // c_t == 1 and C >= 2 * sub_unit:
        c_t = _pick_block(C, sub_unit, max(sub_unit, C // 2))

    # Lane tile: largest multiple of 128 dividing HW, capped so the pass-2
    # double-buffered working set (2 bufs x (P in + P out) x tile) stays
    # inside roughly half the per-generation VMEM budget.
    budget = vmem_limit // 2
    tile_elem_cap = max(128 * 128, budget // (4 * num_parallel * 4))
    m_cap = max(128, (tile_elem_cap // max(c_t, 1)) // 128 * 128)
    m_t = _pick_block(HW, 128, min(8192, m_cap))
    lanep = 128 if m_t % 128 == 0 else 1
    # TODO(synk): when HW is not a multiple of 128 the output last dim is
    # lane-sparse (masked stores); padding + in-kernel masking or a
    # channels-last presentation would recover unmasked stores.

    grid = (C // c_t, N, HW // m_t)

    x_spec = pl.BlockSpec((None, c_t, m_t), lambda c, n, m: (n, c, m))
    cvec_spec = pl.BlockSpec((c_t, 1), lambda c, n, m: (c, 0))

    # -- pass 1: per-channel stats -> scale/shift (reduction over N, HW) --
    scales_shifts = pl.pallas_call(
        functools.partial(_stats_kernel, num_parallel=num_parallel,
                          lanep=lanep, inv_count=inv_count, eps=eps),
        out_shape=[jax.ShapeDtypeStruct((C, 1), jnp.float32)] * (2 * num_parallel),
        grid_spec=pltpu.PrefetchScalarGridSpec(
            num_scalar_prefetch=0,
            grid=grid,
            in_specs=[x_spec] * num_parallel + [cvec_spec] * (2 * num_parallel),
            out_specs=[cvec_spec] * (2 * num_parallel),
            scratch_shapes=[pltpu.VMEM((c_t, lanep), jnp.float32)] * (2 * num_parallel),
        ),
        compiler_params=pltpu.CompilerParams(
            dimension_semantics=("parallel", "arbitrary", "arbitrary"),
            vmem_limit_bytes=vmem_limit,
        ),
    )(*xs_flat, *gs, *bs)
    scales = scales_shifts[:num_parallel]
    shifts = scales_shifts[num_parallel:]

    # -- pass 2: normalize, y = x * scale + shift (no reduction) --
    outs = pl.pallas_call(
        functools.partial(_norm_kernel, num_parallel=num_parallel),
        out_shape=[jax.ShapeDtypeStruct((N, C, HW), xs[i].dtype)
                   for i in range(num_parallel)],
        grid_spec=pltpu.PrefetchScalarGridSpec(
            num_scalar_prefetch=0,
            grid=grid,
            in_specs=[x_spec] * num_parallel + [cvec_spec] * (2 * num_parallel),
            out_specs=[x_spec] * num_parallel,
        ),
        compiler_params=pltpu.CompilerParams(
            dimension_semantics=("parallel", "parallel", "parallel"),
            vmem_limit_bytes=vmem_limit,
        ),
    )(*xs_flat, *scales, *shifts)

    return [o.reshape(N, C, H, W) for o in outs]


class BatchNorm2dParallelPallas:
    """Mirrors the PyTorch BatchNorm2dParallel: one BN per parallel branch."""

    def __init__(self, num_features, num_parallel=2, eps=1e-5):
        self.num_parallel = num_parallel
        self.eps = eps
        # nn.BatchNorm2d init: weight = ones, bias = zeros (deterministic).
        self.gammas = [jnp.ones((num_features,), jnp.float32)
                       for _ in range(num_parallel)]
        self.betas = [jnp.zeros((num_features,), jnp.float32)
                      for _ in range(num_parallel)]
        # TODO(synk): running_mean / running_var buffers are not tracked.

    def __call__(self, x_parallel):
        return batchnorm2d_parallel_pallas(
            x_parallel, self.gammas, self.betas, eps=self.eps)


# --------------------------------------------------------------------------
# reference + test
# --------------------------------------------------------------------------
def _reference_bn(x, gamma, beta, eps=1e-5):
    mean = jnp.mean(x, axis=(0, 2, 3), keepdims=True)
    var = jnp.mean((x - mean) ** 2, axis=(0, 2, 3), keepdims=True)
    return (x - mean) / jnp.sqrt(var + eps) * gamma[None, :, None, None] \
        + beta[None, :, None, None]


if __name__ == "__main__":
    key = jax.random.PRNGKey(0)
    k0, k1, k2, k3 = jax.random.split(key, 4)
    N, C, H, W = 2, 4, 16, 16            # NCHW, matching PyTorch convention
    num_parallel = 2
    x_parallel = [
        jax.random.normal(k0, (N, C, H, W), jnp.float32) * 2.0 + 1.0,
        jax.random.normal(k1, (N, C, H, W), jnp.float32) * 0.5 - 3.0,
    ]

    # 1) Module with default (ones/zeros) affine params -> fast path.
    module = BatchNorm2dParallelPallas(num_features=C, num_parallel=num_parallel)
    outs = module(x_parallel)
    outs = [jax.block_until_ready(o) for o in outs]
    for i, (x, o) in enumerate(zip(x_parallel, outs)):
        ref = _reference_bn(x, module.gammas[i], module.betas[i])
        assert o.shape == x.shape and o.dtype == x.dtype
        assert jnp.max(jnp.abs(o - ref)) < 2e-4, f"branch {i} mismatch (fast path)"

    # 2) Non-trivial gamma/beta to exercise the scale/shift path.
    gammas = [jax.random.normal(k2, (C,), jnp.float32) * 0.3 + 1.0
              for _ in range(num_parallel)]
    betas = [jax.random.normal(k3, (C,), jnp.float32)
             for _ in range(num_parallel)]
    outs2 = batchnorm2d_parallel_pallas(x_parallel, gammas, betas)
    outs2 = [jax.block_until_ready(o) for o in outs2]
    for i, (x, o) in enumerate(zip(x_parallel, outs2)):
        ref = _reference_bn(x, gammas[i], betas[i])
        assert jnp.max(jnp.abs(o - ref)) < 2e-4, f"affine branch {i} mismatch (fast path)"

    # 3) Exercise the streaming two-pass path at the same small shapes.
    outs3 = batchnorm2d_parallel_pallas(x_parallel, gammas, betas,
                                        force_two_pass=True)
    outs3 = [jax.block_until_ready(o) for o in outs3]
    for i, (x, o) in enumerate(zip(x_parallel, outs3)):
        ref = _reference_bn(x, gammas[i], betas[i])
        assert jnp.max(jnp.abs(o - ref)) < 2e-4, f"affine branch {i} mismatch (two-pass)"

    print("KERNEL_OK")
</pallas_src>

<mosaic_0001>
module attributes {stable_mosaic.version = 11 : i64} {
  func.func @_fused_small_kernel(%arg0: memref<2x4x256xf32, #tpu.memory_space<vmem>>, %arg1: memref<2x4x256xf32, #tpu.memory_space<vmem>>, %arg2: memref<4x1xf32, #tpu.memory_space<vmem>>, %arg3: memref<4x1xf32, #tpu.memory_space<vmem>>, %arg4: memref<4x1xf32, #tpu.memory_space<vmem>>, %arg5: memref<4x1xf32, #tpu.memory_space<vmem>>, %arg6: memref<2x4x256xf32, #tpu.memory_space<vmem>>, %arg7: memref<2x4x256xf32, #tpu.memory_space<vmem>>) attributes {dimension_semantics = [], scalar_prefetch = 0 : i64, scratch_operands = 0 : i64, tpu.core_type = #tpu.core_type<tc>} {
    %cst = arith.constant 0.000000e+00 : f32
    %0 = vector.broadcast %cst : f32 to vector<4x1xf32>
    %cst_0 = arith.constant 0.000000e+00 : f32
    %1 = vector.broadcast %cst_0 : f32 to vector<4x1xf32>
    %c0 = arith.constant 0 : index
    %c0_1 = arith.constant 0 : index
    %c0_2 = arith.constant 0 : index
    %2 = vector.load %arg0[%c0, %c0_1, %c0_2] : memref<2x4x256xf32, #tpu.memory_space<vmem>>, vector<1x4x256xf32>
    %3 = vector.shape_cast %2 : vector<1x4x256xf32> to vector<4x256xf32>
    %cst_3 = arith.constant dense<0.000000e+00> : vector<4xf32>
    %4 = vector.multi_reduction <add>, %3, %cst_3 [1] : vector<4x256xf32> to vector<4xf32>
    %5 = vector.shape_cast %4 : vector<4xf32> to vector<4x1xf32>
    %6 = arith.addf %0, %5 : vector<4x1xf32>
    %7 = arith.mulf %3, %3 : vector<4x256xf32>
    %cst_4 = arith.constant dense<0.000000e+00> : vector<4xf32>
    %8 = vector.multi_reduction <add>, %7, %cst_4 [1] : vector<4x256xf32> to vector<4xf32>
    %9 = vector.shape_cast %8 : vector<4xf32> to vector<4x1xf32>
    %10 = arith.addf %1, %9 : vector<4x1xf32>
    %c1 = arith.constant 1 : index
    %c0_5 = arith.constant 0 : index
    %c0_6 = arith.constant 0 : index
    %11 = vector.load %arg0[%c1, %c0_5, %c0_6] : memref<2x4x256xf32, #tpu.memory_space<vmem>>, vector<1x4x256xf32>
    %12 = vector.shape_cast %11 : vector<1x4x256xf32> to vector<4x256xf32>
    %cst_7 = arith.constant dense<0.000000e+00> : vector<4xf32>
    %13 = vector.multi_reduction <add>, %12, %cst_7 [1] : vector<4x256xf32> to vector<4xf32>
    %14 = vector.shape_cast %13 : vector<4xf32> to vector<4x1xf32>
    %15 = arith.addf %6, %14 : vector<4x1xf32>
    %16 = arith.mulf %12, %12 : vector<4x256xf32>
    %cst_8 = arith.constant dense<0.000000e+00> : vector<4xf32>
    %17 = vector.multi_reduction <add>, %16, %cst_8 [1] : vector<4x256xf32> to vector<4xf32>
    %18 = vector.shape_cast %17 : vector<4xf32> to vector<4x1xf32>
    %19 = arith.addf %10, %18 : vector<4x1xf32>
    %cst_9 = arith.constant 0.001953125 : f32
    %20 = vector.broadcast %cst_9 : f32 to vector<4x1xf32>
    %21 = arith.mulf %15, %20 : vector<4x1xf32>
    %cst_10 = arith.constant 0.001953125 : f32
    %22 = vector.broadcast %cst_10 : f32 to vector<4x1xf32>
    %23 = arith.mulf %19, %22 : vector<4x1xf32>
    %24 = arith.mulf %21, %21 : vector<4x1xf32>
    %25 = arith.subf %23, %24 : vector<4x1xf32>
    %cst_11 = arith.constant 0.000000e+00 : f32
    %26 = vector.broadcast %cst_11 : f32 to vector<4x1xf32>
    %27 = arith.maximumf %25, %26 : vector<4x1xf32>
    %cst_12 = arith.constant 9.99999974E-6 : f32
    %28 = vector.broadcast %cst_12 : f32 to vector<4x1xf32>
    %29 = arith.addf %27, %28 : vector<4x1xf32>
    %30 = math.rsqrt %29 : vector<4x1xf32>
    %c0_13 = arith.constant 0 : index
    %c0_14 = arith.constant 0 : index
    %31 = vector.load %arg2[%c0_13, %c0_14] : memref<4x1xf32, #tpu.memory_space<vmem>>, vector<4x1xf32>
    %32 = arith.mulf %31, %30 : vector<4x1xf32>
    %c0_15 = arith.constant 0 : index
    %c0_16 = arith.constant 0 : index
    %33 = vector.load %arg4[%c0_15, %c0_16] : memref<4x1xf32, #tpu.memory_space<vmem>>, vector<4x1xf32>
    %34 = arith.mulf %21, %32 : vector<4x1xf32>
    %35 = arith.subf %33, %34 : vector<4x1xf32>
    %36 = vector.broadcast %32 : vector<4x1xf32> to vector<4x256xf32>
    %37 = arith.mulf %3, %36 : vector<4x256xf32>
    %38 = vector.broadcast %35 : vector<4x1xf32> to vector<4x256xf32>
    %39 = arith.addf %37, %38 : vector<4x256xf32>
    %c0_17 = arith.constant 0 : index
    %c0_18 = arith.constant 0 : index
    %c0_19 = arith.constant 0 : index
    %40 = vector.load %arg6[%c0_17, %c0_18, %c0_19] : memref<2x4x256xf32, #tpu.memory_space<vmem>>, vector<1x4x256xf32>
    %41 = vector.shape_cast %40 : vector<1x4x256xf32> to vector<4x256xf32>
    %42 = vector.shape_cast %39 : vector<4x256xf32> to vector<1x4x256xf32>
    tpu.vector_store %arg6[%c0_17, %c0_18, %c0_19], %42 {strides = array<i32>} : memref<2x4x256xf32, #tpu.memory_space<vmem>>, vector<1x4x256xf32>,
    %43 = vector.broadcast %32 : vector<4x1xf32> to vector<4x256xf32>
    %44 = arith.mulf %12, %43 : vector<4x256xf32>
    %45 = vector.broadcast %35 : vector<4x1xf32> to vector<4x256xf32>
    %46 = arith.addf %44, %45 : vector<4x256xf32>
    %c1_20 = arith.constant 1 : index
    %c0_21 = arith.constant 0 : index
    %c0_22 = arith.constant 0 : index
    %47 = vector.load %arg6[%c1_20, %c0_21, %c0_22] : memref<2x4x256xf32, #tpu.memory_space<vmem>>, vector<1x4x256xf32>
    %48 = vector.shape_cast %47 : vector<1x4x256xf32> to vector<4x256xf32>
    %49 = vector.shape_cast %46 : vector<4x256xf32> to vector<1x4x256xf32>
    tpu.vector_store %arg6[%c1_20, %c0_21, %c0_22], %49 {strides = array<i32>} : memref<2x4x256xf32, #tpu.memory_space<vmem>>, vector<1x4x256xf32>,
    %cst_23 = arith.constant 0.000000e+00 : f32
    %50 = vector.broadcast %cst_23 : f32 to vector<4x1xf32>
    %cst_24 = arith.constant 0.000000e+00 : f32
    %51 = vector.broadcast %cst_24 : f32 to vector<4x1xf32>
    %c0_25 = arith.constant 0 : index
    %c0_26 = arith.constant 0 : index
    %c0_27 = arith.constant 0 : index
    %52 = vector.load %arg1[%c0_25, %c0_26, %c0_27] : memref<2x4x256xf32, #tpu.memory_space<vmem>>, vector<1x4x256xf32>
    %53 = vector.shape_cast %52 : vector<1x4x256xf32> to vector<4x256xf32>
    %cst_28 = arith.constant dense<0.000000e+00> : vector<4xf32>
    %54 = vector.multi_reduction <add>, %53, %cst_28 [1] : vector<4x256xf32> to vector<4xf32>
    %55 = vector.shape_cast %54 : vector<4xf32> to vector<4x1xf32>
    %56 = arith.addf %50, %55 : vector<4x1xf32>
    %57 = arith.mulf %53, %53 : vector<4x256xf32>
    %cst_29 = arith.constant dense<0.000000e+00> : vector<4xf32>
    %58 = vector.multi_reduction <add>, %57, %cst_29 [1] : vector<4x256xf32> to vector<4xf32>
    %59 = vector.shape_cast %58 : vector<4xf32> to vector<4x1xf32>
    %60 = arith.addf %51, %59 : vector<4x1xf32>
    %c1_30 = arith.constant 1 : index
    %c0_31 = arith.constant 0 : index
    %c0_32 = arith.constant 0 : index
    %61 = vector.load %arg1[%c1_30, %c0_31, %c0_32] : memref<2x4x256xf32, #tpu.memory_space<vmem>>, vector<1x4x256xf32>
    %62 = vector.shape_cast %61 : vector<1x4x256xf32> to vector<4x256xf32>
    %cst_33 = arith.constant dense<0.000000e+00> : vector<4xf32>
    %63 = vector.multi_reduction <add>, %62, %cst_33 [1] : vector<4x256xf32> to vector<4xf32>
    %64 = vector.shape_cast %63 : vector<4xf32> to vector<4x1xf32>
    %65 = arith.addf %56, %64 : vector<4x1xf32>
    %66 = arith.mulf %62, %62 : vector<4x256xf32>
    %cst_34 = arith.constant dense<0.000000e+00> : vector<4xf32>
    %67 = vector.multi_reduction <add>, %66, %cst_34 [1] : vector<4x256xf32> to vector<4xf32>
    %68 = vector.shape_cast %67 : vector<4xf32> to vector<4x1xf32>
    %69 = arith.addf %60, %68 : vector<4x1xf32>
    %cst_35 = arith.constant 0.001953125 : f32
    %70 = vector.broadcast %cst_35 : f32 to vector<4x1xf32>
    %71 = arith.mulf %65, %70 : vector<4x1xf32>
    %cst_36 = arith.constant 0.001953125 : f32
    %72 = vector.broadcast %cst_36 : f32 to vector<4x1xf32>
    %73 = arith.mulf %69, %72 : vector<4x1xf32>
    %74 = arith.mulf %71, %71 : vector<4x1xf32>
    %75 = arith.subf %73, %74 : vector<4x1xf32>
    %cst_37 = arith.constant 0.000000e+00 : f32
    %76 = vector.broadcast %cst_37 : f32 to vector<4x1xf32>
    %77 = arith.maximumf %75, %76 : vector<4x1xf32>
    %cst_38 = arith.constant 9.99999974E-6 : f32
    %78 = vector.broadcast %cst_38 : f32 to vector<4x1xf32>
    %79 = arith.addf %77, %78 : vector<4x1xf32>
    %80 = math.rsqrt %79 : vector<4x1xf32>
    %c0_39 = arith.constant 0 : index
    %c0_40 = arith.constant 0 : index
    %81 = vector.load %arg3[%c0_39, %c0_40] : memref<4x1xf32, #tpu.memory_space<vmem>>, vector<4x1xf32>
    %82 = arith.mulf %81, %80 : vector<4x1xf32>
    %c0_41 = arith.constant 0 : index
    %c0_42 = arith.constant 0 : index
    %83 = vector.load %arg5[%c0_41, %c0_42] : memref<4x1xf32, #tpu.memory_space<vmem>>, vector<4x1xf32>
    %84 = arith.mulf %71, %82 : vector<4x1xf32>
    %85 = arith.subf %83, %84 : vector<4x1xf32>
    %86 = vector.broadcast %82 : vector<4x1xf32> to vector<4x256xf32>
    %87 = arith.mulf %53, %86 : vector<4x256xf32>
    %88 = vector.broadcast %85 : vector<4x1xf32> to vector<4x256xf32>
    %89 = arith.addf %87, %88 : vector<4x256xf32>
    %c0_43 = arith.constant 0 : index
    %c0_44 = arith.constant 0 : index
    %c0_45 = arith.constant 0 : index
    %90 = vector.load %arg7[%c0_43, %c0_44, %c0_45] : memref<2x4x256xf32, #tpu.memory_space<vmem>>, vector<1x4x256xf32>
    %91 = vector.shape_cast %90 : vector<1x4x256xf32> to vector<4x256xf32>
    %92 = vector.shape_cast %89 : vector<4x256xf32> to vector<1x4x256xf32>
    tpu.vector_store %arg7[%c0_43, %c0_44, %c0_45], %92 {strides = array<i32>} : memref<2x4x256xf32, #tpu.memory_space<vmem>>, vector<1x4x256xf32>,
    %93 = vector.broadcast %82 : vector<4x1xf32> to vector<4x256xf32>
    %94 = arith.mulf %62, %93 : vector<4x256xf32>
    %95 = vector.broadcast %85 : vector<4x1xf32> to vector<4x256xf32>
    %96 = arith.addf %94, %95 : vector<4x256xf32>
    %c1_46 = arith.constant 1 : index
    %c0_47 = arith.constant 0 : index
    %c0_48 = arith.constant 0 : index
    %97 = vector.load %arg7[%c1_46, %c0_47, %c0_48] : memref<2x4x256xf32, #tpu.memory_space<vmem>>, vector<1x4x256xf32>
    %98 = vector.shape_cast %97 : vector<1x4x256xf32> to vector<4x256xf32>
    %99 = vector.shape_cast %96 : vector<4x256xf32> to vector<1x4x256xf32>
    tpu.vector_store %arg7[%c1_46, %c0_47, %c0_48], %99 {strides = array<i32>} : memref<2x4x256xf32, #tpu.memory_space<vmem>>, vector<1x4x256xf32>,
    return
  }
}

</mosaic_0001>

<bundles_post_ra>
// kernel: tpu_custom_call.1
= control target key start
LH: loop header
LB: loop body
LE: loop exit
PB: predicated region body
PF: predicated region fallthrough
CT: control target
= control target key end

     0   :  { %13 = vsyncpa [#allocation3], 0  ;;  %s724_s0 = inlined_call_operand.hbm [shape: f32[2,4,256], index: 0, kind: input, shape index: {}]   ;;  %s725_s1 = inlined_call_operand.hbm [shape: f32[2,4,256], index: 1, kind: input, shape index: {}]   ;;  %s726_s2 = inlined_call_operand.hbm [shape: f32[4,1], index: 2, kind: input, shape index: {}]   ;;  %s727_s3 = inlined_call_operand.hbm [shape: f32[4,1], index: 3, kind: input, shape index: {}]   ;;  %s728_s4 = inlined_call_operand.hbm [shape: f32[4,1], index: 4, kind: input, shape index: {}]   ;;  %s729_s5 = inlined_call_operand.hbm [shape: f32[4,1], index: 5, kind: input, shape index: {}]   ;;  %s730_s6 = inlined_call_operand.hbm [shape: f32[2,4,256], index: 6, kind: output, shape index: {0}]   ;;  %s731_s7 = inlined_call_operand.hbm [shape: f32[2,4,256], index: 7, kind: output, shape index: {1}]  }
   0x1   :  { %14 = vsyncpa [#allocation6], 0 }
   0x2   :  { %15 = vsyncpa [#allocation9], 0 }
   0x3   :  { %16 = vsyncpa [#allocation12], 0 }
   0x4   :  { %17 = vsyncpa [#allocation4], 0 }
   0x5   :  { %18 = vsyncpa [#allocation15], 0  ;;  %s516_s24 = smov [#allocation5]   ;;  %s517_s26 = smov [#allocation8]  }
   0x6   :  { %s36_s25 = sshll.u32 %s516_s24, 4  ;;  %s59_s27 = sshll.u32 %s517_s26, 4  ;;  %s37_s25 = int_to_ptr.vmem [resolvable:$true] %s36_s25  ;;  %s60_s27 = int_to_ptr.vmem [resolvable:$true] %s59_s27 }
   0x7   :  { %s328_s30 = scalar_lea.hbm %s725_s1, 256 }
   0x8   :  { %p329_p0 = scmp.ne.s32.totalorder %s725_s1, %s328_s30  ;;  %p332_p1 = scmp.lt.u32.totalorder %s328_s30, %s725_s1 }
   0xa   :  { %p334_p2 = pnand %p332_p1, %p329_p0 }
   0xc   :  { %337 = shalt.err (!%p334_p2)
}
   0xd   :  { %s338_s12 = scalar_lea.vmem %s37_s25, 256  ;;  %p343_p4 = scmp.lt.s32.totalorder %s37_s25, %s37_s25 }
   0xe   :  { %p339_p3 = scmp.ne.s32.totalorder %s37_s25, %s338_s12  ;;  %p344_p5 = scmp.lt.s32.totalorder %s338_s12, %s338_s12 }
  0x10   :  { %p345_p6 = por %p344_p5, %p343_p4 }
  0x12   :  { %p346_p7 = pnand %p345_p6, %p339_p3 }
  0x14   :  { %349 = shalt.err (!%p346_p7)
}
  0x15   :  { %s518_s13 = smov 128   ;;  %s519_s14 = smov 8  }
  0x16   :  { %42 = dma.hbm_to_vmem [thread:$0]  %s725_s1, 256, %s37_s25, [#allocation6], %s518_s13, %s518_s13, %s519_s14  }
  0x17   :  { %s350_s19 = scalar_lea.hbm %s727_s3, 64 }
  0x18   :  { %p351_p8 = scmp.ne.s32.totalorder %s727_s3, %s350_s19  ;;  %p354_p9 = scmp.lt.u32.totalorder %s350_s19, %s727_s3 }
  0x1a   :  { %p356_p10 = pnand %p354_p9, %p351_p8 }
  0x1c   :  { %359 = shalt.err (!%p356_p10)
}
  0x1d   :  { %s360_s24 = scalar_lea.vmem %s60_s27, 64  ;;  %p365_p12 = scmp.lt.s32.totalorder %s60_s27, %s60_s27 }
  0x1e   :  { %p361_p11 = scmp.ne.s32.totalorder %s60_s27, %s360_s24  ;;  %p366_p13 = scmp.lt.s32.totalorder %s360_s24, %s360_s24 }
  0x20   :  { %p367_p0 = por %p366_p13, %p365_p12 }
  0x22   :  { %p368_p1 = pnand %p367_p0, %p361_p11 }
  0x24   :  { %371 = shalt.err (!%p368_p1)
}
  0x25   :  { %62 = dma.hbm_to_vmem [thread:$0]  %s727_s3, 64, %s60_s27, [#allocation9]  }
  0x26   :  { %s520_s26 = smov [#allocation2]   ;;  %s521_s29 = smov [#allocation7]  }
  0x27   :  { %s24_s28 = sshll.u32 %s520_s26, 4  ;;  %s49_s30 = sshll.u32 %s521_s29, 4  ;;  %s25_s28 = int_to_ptr.vmem [resolvable:$true] %s24_s28  ;;  %s50_s30 = int_to_ptr.vmem [resolvable:$true] %s49_s30 }
  0x28   :  { %s372_s10 = scalar_lea.hbm %s724_s0, 256 }
  0x29   :  { %p373_p2 = scmp.ne.s32.totalorder %s724_s0, %s372_s10  ;;  %p376_p3 = scmp.lt.u32.totalorder %s372_s10, %s724_s0 }
  0x2b   :  { %p378_p4 = pnand %p376_p3, %p373_p2 }
  0x2d   :  { %381 = shalt.err (!%p378_p4)
}
  0x2e   :  { %s382_s3 = scalar_lea.vmem %s25_s28, 256  ;;  %p387_p6 = scmp.lt.s32.totalorder %s25_s28, %s25_s28 }
  0x2f   :  { %p383_p5 = scmp.ne.s32.totalorder %s25_s28, %s382_s3  ;;  %p388_p7 = scmp.lt.s32.totalorder %s382_s3, %s382_s3 }
  0x31   :  { %p389_p8 = por %p388_p7, %p387_p6 }
  0x33   :  { %p390_p9 = pnand %p389_p8, %p383_p5 }
  0x35   :  { %393 = shalt.err (!%p390_p9)
}
  0x36   :  { %30 = dma.hbm_to_vmem [thread:$0]  %s724_s0, 256, %s25_s28, [#allocation3], %s518_s13, %s518_s13, %s519_s14  }
  0x37   :  { %s394_s20 = scalar_lea.hbm %s726_s2, 64 }
  0x38   :  { %p395_p10 = scmp.ne.s32.totalorder %s726_s2, %s394_s20  ;;  %p398_p11 = scmp.lt.u32.totalorder %s394_s20, %s726_s2 }
  0x3a   :  { %p400_p12 = pnand %p398_p11, %p395_p10 }
  0x3c   :  { %403 = shalt.err (!%p400_p12)
}
  0x3d   :  { %s404_s1 = scalar_lea.vmem %s50_s30, 64  ;;  %p409_p0 = scmp.lt.s32.totalorder %s50_s30, %s50_s30 }
  0x3e   :  { %p405_p13 = scmp.ne.s32.totalorder %s50_s30, %s404_s1  ;;  %p410_p1 = scmp.lt.s32.totalorder %s404_s1, %s404_s1 }
  0x40   :  { %p411_p2 = por %p410_p1, %p409_p0 }
  0x42   :  { %p412_p3 = pnand %p411_p2, %p405_p13 }
  0x44   :  { %415 = shalt.err (!%p412_p3)
}
  0x45   :  { %52 = dma.hbm_to_vmem [thread:$0]  %s726_s2, 64, %s50_s30, [#allocation6]  }
  0x46   :  { %s522_s26 = smov [#allocation10]   ;;  %s523_s29 = smov [#allocation11]  }
  0x47   :  { %s69_s28 = sshll.u32 %s522_s26, 4  ;;  %s79_s8 = sshll.u32 %s523_s29, 4  ;;  %s70_s28 = int_to_ptr.vmem [resolvable:$true] %s69_s28  ;;  %s80_s8 = int_to_ptr.vmem [resolvable:$true] %s79_s8 }
  0x48   :  { %s416_s11 = scalar_lea.hbm %s728_s4, 64 }
  0x49   :  { %p417_p4 = scmp.ne.s32.totalorder %s728_s4, %s416_s11  ;;  %p420_p5 = scmp.lt.u32.totalorder %s416_s11, %s728_s4 }
  0x4b   :  { %p422_p6 = pnand %p420_p5, %p417_p4 }
  0x4d   :  { %425 = shalt.err (!%p422_p6)
}
  0x4e   :  { %s426_s2 = scalar_lea.vmem %s70_s28, 64  ;;  %p431_p8 = scmp.lt.s32.totalorder %s70_s28, %s70_s28 }
  0x4f   :  { %p427_p7 = scmp.ne.s32.totalorder %s70_s28, %s426_s2  ;;  %p432_p9 = scmp.lt.s32.totalorder %s426_s2, %s426_s2 }
  0x51   :  { %p433_p10 = por %p432_p9, %p431_p8 }
  0x53   :  { %p434_p11 = pnand %p433_p10, %p427_p7 }
  0x55   :  { %437 = shalt.err (!%p434_p11)
}
  0x56   :  { %72 = dma.hbm_to_vmem [thread:$0]  %s728_s4, 64, %s70_s28, [#allocation9]  }
  0x57   :  { %s438_s19 = scalar_lea.hbm %s729_s5, 64 }
  0x58   :  { %p439_p12 = scmp.ne.s32.totalorder %s729_s5, %s438_s19  ;;  %p442_p13 = scmp.lt.u32.totalorder %s438_s19, %s729_s5 }
  0x5a   :  { %p444_p0 = pnand %p442_p13, %p439_p12 }
  0x5c   :  { %447 = shalt.err (!%p444_p0)
}
  0x5d   :  { %s448_s24 = scalar_lea.vmem %s80_s8, 64  ;;  %p453_p2 = scmp.lt.s32.totalorder %s80_s8, %s80_s8 }
  0x5e   :  { %p449_p1 = scmp.ne.s32.totalorder %s80_s8, %s448_s24  ;;  %p454_p3 = scmp.lt.s32.totalorder %s448_s24, %s448_s24 }
  0x60   :  { %p455_p4 = por %p454_p3, %p453_p2 }
  0x62   :  { %p456_p5 = pnand %p455_p4, %p449_p1 }
  0x64   :  { %459 = shalt.err (!%p456_p5)
}
  0x65   :  { %82 = dma.hbm_to_vmem [thread:$0]  %s729_s5, 64, %s80_s8, [#allocation12]  }
  0x66   :  { %504 = dma.done.wait [#allocation3], 256  }
  0x67   :  { %505 = vsyncadd [#allocation3], 4294967040 }
  0x68   :  { %506 = dma.done.wait [#allocation6], 320  }
  0x69   :  { %507 = vsyncadd [#allocation6], 4294966976 }
  0x6a   :  { %508 = dma.done.wait [#allocation9], 128  }
  0x6b   :  { %509 = vsyncadd [#allocation9], 4294967168 }
  0x6c   :  { %510 = dma.done.wait [#allocation12], 64  }
  0x6d   :  { %511 = vsyncadd [#allocation12], 4294967232  ;;  %vm105_vm0 = vcmask 1043456   ;;  %v646_v0 = vld [vmem:[#allocation5] sm:$0xff]  ;;  %v648_v1 = vld [vmem:[#allocation2] sm:$0xff]  ;;  %v524_v40 = vmov 0  }
  0x6e   :  { %v650_v2 = vld [vmem:[#allocation5 + $0x8] sm:$0xff]  ;;  %v188_v3 = vcombine.high %v646_v0, %v646_v0  ;;  %v190_v4 = vsel %vm105_vm0, %v646_v0, 0.0  ;;  %v103_v5 = vcombine.high %v648_v1, %v648_v1  ;;  %v106_v6 = vsel %vm105_vm0, %v648_v1, 0.0  ;;  %v660_v7 = vld [vmem:[#allocation2 + $0x8] sm:$0xff]  ;;  %318 = vset.pattern.permute.xlu0 %v524_v40  ;;  %319 = vset.pattern.permute.xlu1 %v524_v40  ;;  %s526_s5 = smov [#allocation13]   ;;  %s527_s25 = smov [#allocation14]  }
  0x6f   :  { %v209_v8 = vcombine.high %v650_v2, %v650_v2  ;;  %v211_v9 = vsel %vm105_vm0, %v650_v2, 0.0  ;;  %v125_v10 = vcombine.high %v660_v7, %v660_v7  ;;  %v127_v11 = vsel %vm105_vm0, %v660_v7, 0.0  ;;  %s275_s0 = sshll.u32 %s526_s5, 4  ;;  %s287_s26 = sshll.u32 %s527_s25, 4  ;;  %s276_s0 = int_to_ptr.vmem [resolvable:$true] %s275_s0  ;;  %s288_s26 = int_to_ptr.vmem [resolvable:$true] %s287_s26 }
  0x70   :  { %v191_v12 = vsel %vm105_vm0, %v188_v3, 0.0  ;;  %v107_v13 = vsel %vm105_vm0, %v103_v5, 0.0  ;;  %v133_v14 = vmul.f32 %v660_v7, %v660_v7  ;;  %v112_v15 = vmul.f32 %v648_v1, %v648_v1  ;;  %s460_s28 = scalar_lea.vmem %s276_s0, 256  ;;  %p465_p7 = scmp.lt.s32.totalorder %s276_s0, %s276_s0 }
  0x71   :  { %v192_v16 = vadd.f32 %v191_v12, %v190_v4  ;;  %v108_v17 = vadd.f32 %v107_v13, %v106_v6  ;;  %v212_v18 = vsel %vm105_vm0, %v209_v8, 0.0  ;;  %v128_v19 = vsel %vm105_vm0, %v125_v10, 0.0  ;;  %v150_v4 = vld [vmem:[#allocation7] sm:$0xf]  ;;  %v234_v8 = vld [vmem:[#allocation8] sm:$0xf]  ;;  %p461_p6 = scmp.ne.s32.totalorder %s276_s0, %s460_s28  ;;  %p466_p8 = scmp.lt.s32.totalorder %s460_s28, %s460_s28 }
  0x72   :  { %v213_v20 = vadd.f32 %v212_v18, %v211_v9  ;;  %v129_v21 = vadd.f32 %v128_v19, %v127_v11  ;;  %v135_v22 = vcombine.high %v133_v14, %v133_v14  ;;  %v114_v23 = vcombine.high %v112_v15, %v112_v15  ;;  %v152_v12 = vld [vmem:[#allocation10] sm:$0xf] }
  0x73   :  { %193 = vadd.xlane.f32.xlu1 %v192_v16  ;;  %109 = vadd.xlane.f32.xlu0 %v108_v17  ;;  %v217_v24 = vmul.f32 %v650_v2, %v650_v2  ;;  %v196_v25 = vmul.f32 %v646_v0, %v646_v0  ;;  %v137_v26 = vsel %vm105_vm0, %v133_v14, 0.0  ;;  %v116_v28 = vsel %vm105_vm0, %v112_v15, 0.0  ;;  %v236_v15 = vld [vmem:[#allocation11] sm:$0xf]  ;;  %p467_p9 = por %p466_p8, %p465_p7 }
  0x74   :  { %v138_v27 = vsel %vm105_vm0, %v135_v22, 0.0  ;;  %v117_v29 = vsel %vm105_vm0, %v114_v23, 0.0  ;;  %v525_v17 = vmov 839922192   ;;  %v162_v19 = vlaneseq }
  0x75   :  { %v219_v30 = vcombine.high %v217_v24, %v217_v24  ;;  %v198_v31 = vcombine.high %v196_v25, %v196_v25  ;;  %v139_v32 = vadd.f32 %v138_v27, %v137_v26  ;;  %v118_v33 = vadd.f32 %v117_v29, %v116_v28  ;;  %p468_p10 = pnand %p467_p9, %p461_p6 }
  0x76   :  { %v221_v34 = vsel %vm105_vm0, %v217_v24, 0.0  ;;  %v200_v36 = vsel %vm105_vm0, %v196_v25, 0.0  ;;  %v160_v18 = vunpack.c.l.s4 %v525_v17 }
  0x77   :  { %214 = vadd.xlane.f32.xlu1 %v213_v20  ;;  %130 = vadd.xlane.f32.xlu0 %v129_v21  ;;  %v222_v35 = vsel %vm105_vm0, %v219_v30, 0.0  ;;  %v201_v37 = vsel %vm105_vm0, %v198_v31, 0.0  ;;  %v163_v21 = vshrl.u32 %v162_v19, 7 }
  0x78   :  { %v223_v38 = vadd.f32 %v222_v35, %v221_v34  ;;  %v202_v39 = vadd.f32 %v201_v37, %v200_v36  ;;  %v161_v20 = vunpack.c.0.s8 %v160_v18 }
  0x7a   :  { %v164_v22 = vsub.s32 %v161_v20, %v163_v21 }
  0x7b   :  { %140 = vadd.xlane.f32.xlu1 %v139_v32  ;;  %119 = vadd.xlane.f32.xlu0 %v118_v33 }
  0x7f   :  { %224 = vadd.xlane.f32.xlu1 %v223_v38  ;;  %203 = vadd.xlane.f32.xlu0 %v202_v39 }
 0x100   :  { %v194_v41 = vpop.xlane.xlu1 %193  ;;  %v110_v42 = vpop.xlane.xlu0 %109 }
 0x104   :  { %v215_v43 = vpop.xlane.xlu1 %214  ;;  %v131_v44 = vpop.xlane.xlu0 %130 }
 0x105   :  { %v132_v45 = vadd.f32 %v131_v44, %v110_v42  ;;  %v216_v46 = vadd.f32 %v215_v43, %v194_v41 }
 0x107   :  { %v143_v47 = vmul.f32 0.001953125, %v132_v45  ;;  %v227_v51 = vmul.f32 0.001953125, %v216_v46 }
 0x108   :  { %v141_v48 = vpop.xlane.xlu1 %140  ;;  %v120_v49 = vpop.xlane.xlu0 %119 }
 0x109   :  { %v142_v50 = vadd.f32 %v141_v48, %v120_v49  ;;  %v145_v52 = vmul.f32 %v143_v47, %v143_v47  ;;  %v229_v58 = vmul.f32 %v227_v51, %v227_v51 }
 0x10b   :  { %v144_v53 = vmul.f32 0.001953125, %v142_v50 }
 0x10c   :  { %v225_v54 = vpop.xlane.xlu1 %224  ;;  %v204_v55 = vpop.xlane.xlu0 %203 }
 0x10d   :  { %v146_v56 = vsub.f32 %v144_v53, %v145_v52  ;;  %v226_v57 = vadd.f32 %v225_v54, %v204_v55 }
 0x10f   :  { %v147_v59 = vmax.f32 %v146_v56, 0.0  ;;  %v228_v60 = vmul.f32 0.001953125, %v226_v57 }
 0x111   :  { %v148_v61 = vadd.f32 1e-05, %v147_v59  ;;  %v230_v62 = vsub.f32 %v228_v60, %v229_v58 }
 0x113   :  { %324 = vrsqrt.f32 %v148_v61  ;;  %v231_v63 = vmax.f32 %v230_v62, 0.0 }
 0x115   :  { %v232_v3 = vadd.f32 1e-05, %v231_v63 }
 0x117   :  { %326 = vrsqrt.f32 %v232_v3 }
 0x11d   :  { %v325_v5 = vpop.eup %324 }
 0x11e   :  { %v151_v6 = vmul.f32 %v325_v5, %v150_v4 }
 0x120   :  { %157 = vperm.xlu0 %318, %v151_v6   ;;  %v153_v11 = vmul.f32 %v151_v6, %v143_v47 }
 0x121   :  { %v327_v9 = vpop.eup %326 }
 0x122   :  { %v235_v10 = vmul.f32 %v327_v9, %v234_v8  ;;  %v154_v13 = vsub.f32 %v152_v12, %v153_v11 }
 0x124   :  { %241 = vperm.xlu1 %319, %v235_v10   ;;  %v237_v14 = vmul.f32 %v235_v10, %v227_v51 }
 0x126   :  { %v238_v16 = vsub.f32 %v236_v15, %v237_v14 }
 0x128   :  { %170 = vperm.xlu1 %319, %v154_v13  }
 0x12c   :  { %254 = vperm.xlu1 %319, %v238_v16  }
 0x19f   :  { %v158_v23 = vpop.permute.xlu0 %157 }
 0x1a0   :  { %v165_v25 = vrot.slane %v158_v23, %v164_v22 }
 0x1a2   :  { %v167_v27 = vmul.f32 %v165_v25, %v648_v1  ;;  %v182_v28 = vmul.f32 %v165_v25, %v660_v7 }
 0x1a3   :  { %v242_v24 = vpop.permute.xlu1 %241 }
 0x1a4   :  { %v249_v29 = vrot.slane %v242_v24, %v164_v22 }
 0x1a6   :  { %v251_v34 = vmul.f32 %v249_v29, %v646_v0  ;;  %v266_v35 = vmul.f32 %v249_v29, %v650_v2 }
 0x1a7   :  { %v171_v26 = vpop.permute.xlu1 %170 }
 0x1a8   :  { %v178_v30 = vrot.slane %v171_v26, %v164_v22 }
 0x1aa   :  { %v180_v31 = vadd.f32 %v178_v30, %v167_v27  ;;  %v183_v32 = vadd.f32 %v182_v28, %v178_v30 }
 0x1ab   :  { %v255_v33 = vpop.permute.xlu1 %254 }
 0x1ac   :  { %181 = vst [vmem:[#allocation13] sm:$0xff] %v180_v31  ;;  %185 = vst [vmem:[#allocation13 + $0x8] sm:$0xff] %v183_v32  ;;  %v262_v36 = vrot.slane %v255_v33, %v164_v22 }
 0x1ad   :  { %471 = shalt.err (!%p468_p10)
}
 0x1ae   :  { %s472_s9 = scalar_lea.hbm %s730_s6, 256 }
 0x1af   :  { %p473_p11 = scmp.ne.s32.totalorder %s730_s6, %s472_s9  ;;  %p476_p12 = scmp.lt.u32.totalorder %s472_s9, %s730_s6 }
 0x1b1   :  { %p478_p13 = pnand %p476_p12, %p473_p11 }
 0x1b3   :  { %481 = shalt.err (!%p478_p13)
}
 0x1b4   :  { %281 = dma.vmem_to_hbm [thread:$0]  %s276_s0, 256, %s730_s6, [#allocation4], %s518_s13, %s518_s13, %s519_s14   ;;  %v264_v0 = vadd.f32 %v262_v36, %v251_v34  ;;  %v267_v1 = vadd.f32 %v266_v35, %v262_v36 }
 0x1b5   :  { %s482_s2 = scalar_lea.vmem %s288_s26, 256  ;;  %p487_p1 = scmp.lt.s32.totalorder %s288_s26, %s288_s26 }
 0x1b6   :  { %265 = vst [vmem:[#allocation14] sm:$0xff] %v264_v0  ;;  %269 = vst [vmem:[#allocation14 + $0x8] sm:$0xff] %v267_v1  ;;  %p483_p0 = scmp.ne.s32.totalorder %s288_s26, %s482_s2  ;;  %p488_p2 = scmp.lt.s32.totalorder %s482_s2, %s482_s2 }
 0x1b8   :  { %p489_p3 = por %p488_p2, %p487_p1 }
 0x1ba   :  { %p490_p4 = pnand %p489_p3, %p483_p0 }
 0x1bc   :  { %493 = shalt.err (!%p490_p4)
}
 0x1bd   :  { %s494_s17 = scalar_lea.hbm %s731_s7, 256 }
 0x1be   :  { %p495_p5 = scmp.ne.s32.totalorder %s731_s7, %s494_s17  ;;  %p498_p6 = scmp.lt.u32.totalorder %s494_s17, %s731_s7 }
 0x1c0   :  { %p500_p7 = pnand %p498_p6, %p495_p5 }
 0x1c2   :  { %503 = shalt.err (!%p500_p7)
}
 0x1c3   :  { %293 = dma.vmem_to_hbm [thread:$0]  %s288_s26, 256, %s731_s7, [#allocation15], %s518_s13, %s518_s13, %s519_s14  }
 0x1c4   :  { %512 = dma.done.wait [#allocation4], 256  }
 0x1c5   :  { %513 = vsyncadd [#allocation4], 4294967040 }
 0x1c6   :  { %514 = dma.done.wait [#allocation15], 256  }
 0x1c7   :  { %515 = vsyncadd [#allocation15], 4294967040 }
 0x1c8   :  { %300 = vsyncpa [#allocation3], 1 }
 0x1c9   :  { %301 = vsyncpa [#allocation6], 1 }
 0x1ca   :  { %302 = vsyncpa [#allocation9], 1 }
 0x1cb   :  { %303 = vsyncpa [#allocation12], 1 }
 0x1cc   :  { %304 = vsyncpa [#allocation4], 1 }
 0x1cd   :  { %305 = vsyncpa [#allocation15], 1 }

</bundles_post_ra>
